<compile_context>
chip_gen: v7x
topology: tpu7x:2x2x1
jax: 0.10.0
libtpu: 0.0.40
codegen_flags: <defaults>
</compile_context>

<pallas_src>
import jax
import jax.numpy as jnp
from jax.experimental import pallas as pl
from jax.experimental.pallas import tpu as pltpu

_LANES = 128                 # vreg lane width: vocab chunk size / batch sub-tile
_DEF_BATCH_TILE = 512        # batch lanes per grid step (review: 512-1024 sweet spot)
_DEF_CHUNKS_PER_STEP = 8     # 128-row vocab chunks streamed per vocab grid step
                             # (raise to 32-64 for production-sized vocabularies)


def _round_up(x, m):
    return (x + m - 1) // m * m


def _linear_logit_kernel(x_ref, w_ref, o_ref):
    """Grid = (batch_tiles [parallel], vocab_tiles [arbitrary, innermost]).

    x_ref: [F, TB]   int32 feature-major ids for this batch tile
    w_ref: [C, 128]  f32 lane-dense table rows [v*C, (v+1)*C) of the chunked table
    o_ref: [1, TB]   f32 logits, resident across the vocab axis (accumulated)
    """
    v = pl.program_id(1)
    f, tb = x_ref.shape
    cpt = w_ref.shape[0]
    n_sub = tb // _LANES

    @pl.when(v == 0)
    def _init():
        o_ref[...] = jnp.zeros_like(o_ref)

    idx = x_ref[...]                              # [F, TB]
    # Hoisted once per tile (was per-chunk subtract / double-compare / clip):
    chunk_id = idx >> 7                           # arithmetic shift == floor(idx / 128)
    lane = idx & (_LANES - 1)                     # always in [0, 128) (even for junk ids)

    base = v * cpt
    lanes = [lane[:, s * _LANES:(s + 1) * _LANES] for s in range(n_sub)]
    cids = [chunk_id[:, s * _LANES:(s + 1) * _LANES] for s in range(n_sub)]
    accs = [jnp.zeros((f, _LANES), jnp.float32) for _ in range(n_sub)]

    # Static loop: cpt is a small constant (vocab scaling happens on the grid
    # axis), so full unroll stays cheap and visible to the LLO scheduler.
    for c in range(cpt):
        # One chunk row replicated over the feature sublanes.  (A stride-0
        # sublane-broadcast load is the micro-opt alternative; broadcast_to
        # kept for portability.)
        w_row = jnp.broadcast_to(w_ref[c:c + 1, :], (f, _LANES))
        cid = base + c
        for s in range(n_sub):
            vals = jnp.take_along_axis(w_row, lanes[s], axis=1)      # lane gather (XLU)
            accs[s] = accs[s] + jnp.where(cids[s] == cid, vals, 0.0)

    # Reduce over feature sublanes; lane-dense accumulate into the resident output.
    for s in range(n_sub):
        o_ref[0:1, s * _LANES:(s + 1) * _LANES] += jnp.sum(
            accs[s], axis=0, keepdims=True)


def pack_linear_table(w, chunks_per_step=_DEF_CHUNKS_PER_STEP):
    """One-time (init-time) repack of the [V, 1] shared 'all' embedding table
    into a lane-dense [n_chunks_padded, 128] f32 layout.  Cache across calls."""
    assert chunks_per_step % 8 == 0
    v_rows = w.shape[0]
    n_chunks = pl.cdiv(v_rows, _LANES)
    n_chunks_pad = _round_up(max(n_chunks, 1), chunks_per_step)
    flat = jnp.zeros((n_chunks_pad * _LANES,), jnp.float32)
    flat = flat.at[:v_rows].set(w.reshape(-1).astype(jnp.float32))
    return flat.reshape(n_chunks_pad, _LANES)


def linear_logit(x_fm, w_chunks, *, batch_tile=_DEF_BATCH_TILE,
                 chunks_per_step=_DEF_CHUNKS_PER_STEP):
    """logit[b] = sum_f w_table[x_fm[f, b]].

    x_fm     : [F, B] integer ids, feature-major (batch on the lane axis).
    w_chunks : [n_chunks_pad, 128] table from pack_linear_table.
    returns  : [B, 1] float32.
    """
    f, b = x_fm.shape
    if f == 0:
        return jnp.zeros((b, 1), jnp.float32)
    assert chunks_per_step % 8 == 0
    n_chunks_pad = w_chunks.shape[0]
    assert n_chunks_pad % chunks_per_step == 0

    tb = max(_LANES, min(_round_up(batch_tile, _LANES), _round_up(b, _LANES)))
    nb = pl.cdiv(b, tb)
    nv = n_chunks_pad // chunks_per_step
    b_pad = nb * tb

    out = pl.pallas_call(
        _linear_logit_kernel,
        out_shape=jax.ShapeDtypeStruct((1, b_pad), jnp.float32),
        grid_spec=pltpu.PrefetchScalarGridSpec(
            num_scalar_prefetch=0,
            grid=(nb, nv),                     # vocab (reduction) axis innermost
            in_specs=[
                # feature-major index tile: batch on lanes; ragged tail handled
                # by Pallas partial-block masking (those lanes are sliced away
                # below), so no host-side pad/transpose copy is materialized.
                pl.BlockSpec((f, tb), lambda i, v: (0, i)),
                # streamed table chunk-tile (double-buffered by the pipeline)
                pl.BlockSpec((chunks_per_step, _LANES), lambda i, v: (v, 0)),
            ],
            out_specs=pl.BlockSpec((1, tb), lambda i, v: (0, i)),
        ),
        compiler_params=pltpu.CompilerParams(
            # batch axis parallel (v7x dual-TC sharding; verify in a trace,
            # else switch to pltpu.CORE_PARALLEL); vocab axis is a reduction.
            dimension_semantics=("parallel", "arbitrary"),
            vmem_limit_bytes=32 * 1024 * 1024,
        ),
    )(jnp.asarray(x_fm, jnp.int32), w_chunks)

    return out[0, :b].reshape(b, 1)


def linear_forward(x_idx, w, **kwargs):
    """Module-compatible entry point: x_idx [B, F] ids, w [V, 1] -> [B, 1].

    The per-call transpose + table repack here exist only for API parity with
    the torch module; production callers should keep indices feature-major and
    call pack_linear_table once at init (see __main__)."""
    return linear_logit(jnp.asarray(x_idx, jnp.int32).T, pack_linear_table(w), **kwargs)


if __name__ == "__main__":
    key = jax.random.PRNGKey(0)
    k_w, k_x = jax.random.split(key)

    B = 200          # ragged batch (not a multiple of 128/512) -> partial-tile path
    F = 6            # number of sparse feature columns
    V = 300          # total_feature_num
    init_std = 0.0001

    # nn.Embedding(total_feature_num, 1) init ~ N(0, init_std)
    w = (init_std * jax.random.normal(k_w, (V, 1))).astype(jnp.float32)
    # feature-major ids, as a data loader / preprocessing step would emit them
    x_fm = jax.random.randint(k_x, (F, B), 0, V, dtype=jnp.int32)

    # init-time table repack (cached across forward calls)
    w_chunks = pack_linear_table(w)

    out = jax.block_until_ready(linear_logit(x_fm, w_chunks))

    # Plain-JAX reference of the PyTorch forward
    ref = jnp.sum(w[:, 0][x_fm], axis=0).reshape(B, 1)

    assert out.shape == (B, 1), out.shape
    assert jnp.allclose(out, ref, rtol=1e-5, atol=1e-8), (out, ref)

    # module-compatible ([B, F] input) convenience path
    out2 = jax.block_until_ready(linear_forward(x_fm.T, w))
    assert jnp.allclose(out2, ref, rtol=1e-5, atol=1e-8)

    print("KERNEL_OK")
</pallas_src>

<mosaic_0001>
module attributes {stable_mosaic.version = 11 : i64} {
  func.func @_linear_logit_kernel(%arg0: i32, %arg1: i32, %arg2: memref<6x256xi32, #tpu.memory_space<vmem>>, %arg3: memref<8x128xf32, #tpu.memory_space<vmem>>, %arg4: memref<1x256xf32, #tpu.memory_space<vmem>>) attributes {dimension_semantics = [#tpu.dimension_semantics<parallel>, #tpu.dimension_semantics<arbitrary>], iteration_bounds = array<i64: 1, 1>, scalar_prefetch = 0 : i64, scratch_operands = 0 : i64, tpu.core_type = #tpu.core_type<tc>, window_params = [{transform_indices = @transform_0, window_bounds = array<i64: 6, 256>}, {transform_indices = @transform_1, window_bounds = array<i64: 8, 128>}, {transform_indices = @transform_2, window_bounds = array<i64: 1, 256>}]} {
    %c0_i32 = arith.constant 0 : i32
    %0 = arith.cmpi eq, %arg1, %c0_i32 : i32
    %1 = arith.extui %0 : i1 to i32
    %c0_i32_0 = arith.constant 0 : i32
    %2 = arith.cmpi ne, %1, %c0_i32_0 : i32
    scf.if %2 {
      %cst_70 = arith.constant 0.000000e+00 : f32
      %265 = vector.broadcast %cst_70 : f32 to vector<1x256xf32>
      %c0_71 = arith.constant 0 : index
      %c0_72 = arith.constant 0 : index
      %266 = vector.load %arg4[%c0_71, %c0_72] : memref<1x256xf32, #tpu.memory_space<vmem>>, vector<1x256xf32>
      tpu.vector_store %arg4[%c0_71, %c0_72], %265 {strides = array<i32>} : memref<1x256xf32, #tpu.memory_space<vmem>>, vector<1x256xf32>,
    } else {
    }
    %c0 = arith.constant 0 : index
    %c0_1 = arith.constant 0 : index
    %3 = vector.load %arg2[%c0, %c0_1] : memref<6x256xi32, #tpu.memory_space<vmem>>, vector<6x256xi32>
    %c7_i32 = arith.constant 7 : i32
    %4 = vector.broadcast %c7_i32 : i32 to vector<6x256xi32>
    %5 = arith.shrsi %3, %4 : vector<6x256xi32>
    %c127_i32 = arith.constant 127 : i32
    %6 = vector.broadcast %c127_i32 : i32 to vector<6x256xi32>
    %7 = arith.andi %3, %6 : vector<6x256xi32>
    %c8_i32 = arith.constant 8 : i32
    %8 = arith.muli %arg1, %c8_i32 : i32
    %9 = vector.extract_strided_slice %7 {offsets = [0, 0], sizes = [6, 128], strides = [1, 1]} : vector<6x256xi32> to vector<6x128xi32>
    %10 = vector.extract_strided_slice %7 {offsets = [0, 128], sizes = [6, 128], strides = [1, 1]} : vector<6x256xi32> to vector<6x128xi32>
    %11 = vector.extract_strided_slice %5 {offsets = [0, 0], sizes = [6, 128], strides = [1, 1]} : vector<6x256xi32> to vector<6x128xi32>
    %12 = vector.extract_strided_slice %5 {offsets = [0, 128], sizes = [6, 128], strides = [1, 1]} : vector<6x256xi32> to vector<6x128xi32>
    %cst = arith.constant 0.000000e+00 : f32
    %13 = vector.broadcast %cst : f32 to vector<6x128xf32>
    %cst_2 = arith.constant 0.000000e+00 : f32
    %14 = vector.broadcast %cst_2 : f32 to vector<6x128xf32>
    %c0_3 = arith.constant 0 : index
    %c0_4 = arith.constant 0 : index
    %15 = vector.load %arg3[%c0_3, %c0_4] : memref<8x128xf32, #tpu.memory_space<vmem>>, vector<1x128xf32>
    %16 = vector.shape_cast %15 : vector<1x128xf32> to vector<1x128xf32>
    %17 = vector.broadcast %16 : vector<1x128xf32> to vector<6x128xf32>
    %c0_i32_5 = arith.constant 0 : i32
    %18 = arith.addi %8, %c0_i32_5 : i32
    %c0_i32_6 = arith.constant 0 : i32
    %19 = vector.broadcast %c0_i32_6 : i32 to vector<6x128xi32>
    %20 = arith.cmpi slt, %9, %19 : vector<6x128xi32>
    %c128_i32 = arith.constant 128 : i32
    %21 = vector.broadcast %c128_i32 : i32 to vector<6x128xi32>
    %22 = arith.addi %9, %21 : vector<6x128xi32>
    %23 = arith.select %20, %22, %9 : vector<6x128xi1>, vector<6x128xi32>
    %24 = vector.shape_cast %23 : vector<6x128xi32> to vector<6x128x1xi32>
    %25 = vector.shape_cast %24 : vector<6x128x1xi32> to vector<6x128xi32>
    %26 = tpu.dynamic_gather %17[%25] in [1] : vector<6x128xf32>, vector<6x128xi32> -> vector<6x128xf32>
    %27 = vector.broadcast %18 : i32 to vector<6x128xi32>
    %28 = arith.cmpi eq, %11, %27 : vector<6x128xi32>
    %cst_7 = arith.constant 0.000000e+00 : f32
    %29 = vector.broadcast %cst_7 : f32 to vector<6x128xf32>
    %30 = arith.select %28, %26, %29 : vector<6x128xi1>, vector<6x128xf32>
    %31 = arith.addf %13, %30 : vector<6x128xf32>
    %c0_i32_8 = arith.constant 0 : i32
    %32 = vector.broadcast %c0_i32_8 : i32 to vector<6x128xi32>
    %33 = arith.cmpi slt, %10, %32 : vector<6x128xi32>
    %c128_i32_9 = arith.constant 128 : i32
    %34 = vector.broadcast %c128_i32_9 : i32 to vector<6x128xi32>
    %35 = arith.addi %10, %34 : vector<6x128xi32>
    %36 = arith.select %33, %35, %10 : vector<6x128xi1>, vector<6x128xi32>
    %37 = vector.shape_cast %36 : vector<6x128xi32> to vector<6x128x1xi32>
    %38 = vector.shape_cast %37 : vector<6x128x1xi32> to vector<6x128xi32>
    %39 = tpu.dynamic_gather %17[%38] in [1] : vector<6x128xf32>, vector<6x128xi32> -> vector<6x128xf32>
    %40 = vector.broadcast %18 : i32 to vector<6x128xi32>
    %41 = arith.cmpi eq, %12, %40 : vector<6x128xi32>
    %cst_10 = arith.constant 0.000000e+00 : f32
    %42 = vector.broadcast %cst_10 : f32 to vector<6x128xf32>
    %43 = arith.select %41, %39, %42 : vector<6x128xi1>, vector<6x128xf32>
    %44 = arith.addf %14, %43 : vector<6x128xf32>
    %c1 = arith.constant 1 : index
    %c0_11 = arith.constant 0 : index
    %45 = vector.load %arg3[%c1, %c0_11] : memref<8x128xf32, #tpu.memory_space<vmem>>, vector<1x128xf32>
    %46 = vector.shape_cast %45 : vector<1x128xf32> to vector<1x128xf32>
    %47 = vector.broadcast %46 : vector<1x128xf32> to vector<6x128xf32>
    %c1_i32 = arith.constant 1 : i32
    %48 = arith.addi %8, %c1_i32 : i32
    %c0_i32_12 = arith.constant 0 : i32
    %49 = vector.broadcast %c0_i32_12 : i32 to vector<6x128xi32>
    %50 = arith.cmpi slt, %9, %49 : vector<6x128xi32>
    %c128_i32_13 = arith.constant 128 : i32
    %51 = vector.broadcast %c128_i32_13 : i32 to vector<6x128xi32>
    %52 = arith.addi %9, %51 : vector<6x128xi32>
    %53 = arith.select %50, %52, %9 : vector<6x128xi1>, vector<6x128xi32>
    %54 = vector.shape_cast %53 : vector<6x128xi32> to vector<6x128x1xi32>
    %55 = vector.shape_cast %54 : vector<6x128x1xi32> to vector<6x128xi32>
    %56 = tpu.dynamic_gather %47[%55] in [1] : vector<6x128xf32>, vector<6x128xi32> -> vector<6x128xf32>
    %57 = vector.broadcast %48 : i32 to vector<6x128xi32>
    %58 = arith.cmpi eq, %11, %57 : vector<6x128xi32>
    %cst_14 = arith.constant 0.000000e+00 : f32
    %59 = vector.broadcast %cst_14 : f32 to vector<6x128xf32>
    %60 = arith.select %58, %56, %59 : vector<6x128xi1>, vector<6x128xf32>
    %61 = arith.addf %31, %60 : vector<6x128xf32>
    %c0_i32_15 = arith.constant 0 : i32
    %62 = vector.broadcast %c0_i32_15 : i32 to vector<6x128xi32>
    %63 = arith.cmpi slt, %10, %62 : vector<6x128xi32>
    %c128_i32_16 = arith.constant 128 : i32
    %64 = vector.broadcast %c128_i32_16 : i32 to vector<6x128xi32>
    %65 = arith.addi %10, %64 : vector<6x128xi32>
    %66 = arith.select %63, %65, %10 : vector<6x128xi1>, vector<6x128xi32>
    %67 = vector.shape_cast %66 : vector<6x128xi32> to vector<6x128x1xi32>
    %68 = vector.shape_cast %67 : vector<6x128x1xi32> to vector<6x128xi32>
    %69 = tpu.dynamic_gather %47[%68] in [1] : vector<6x128xf32>, vector<6x128xi32> -> vector<6x128xf32>
    %70 = vector.broadcast %48 : i32 to vector<6x128xi32>
    %71 = arith.cmpi eq, %12, %70 : vector<6x128xi32>
    %cst_17 = arith.constant 0.000000e+00 : f32
    %72 = vector.broadcast %cst_17 : f32 to vector<6x128xf32>
    %73 = arith.select %71, %69, %72 : vector<6x128xi1>, vector<6x128xf32>
    %74 = arith.addf %44, %73 : vector<6x128xf32>
    %c2 = arith.constant 2 : index
    %c0_18 = arith.constant 0 : index
    %75 = vector.load %arg3[%c2, %c0_18] : memref<8x128xf32, #tpu.memory_space<vmem>>, vector<1x128xf32>
    %76 = vector.shape_cast %75 : vector<1x128xf32> to vector<1x128xf32>
    %77 = vector.broadcast %76 : vector<1x128xf32> to vector<6x128xf32>
    %c2_i32 = arith.constant 2 : i32
    %78 = arith.addi %8, %c2_i32 : i32
    %c0_i32_19 = arith.constant 0 : i32
    %79 = vector.broadcast %c0_i32_19 : i32 to vector<6x128xi32>
    %80 = arith.cmpi slt, %9, %79 : vector<6x128xi32>
    %c128_i32_20 = arith.constant 128 : i32
    %81 = vector.broadcast %c128_i32_20 : i32 to vector<6x128xi32>
    %82 = arith.addi %9, %81 : vector<6x128xi32>
    %83 = arith.select %80, %82, %9 : vector<6x128xi1>, vector<6x128xi32>
    %84 = vector.shape_cast %83 : vector<6x128xi32> to vector<6x128x1xi32>
    %85 = vector.shape_cast %84 : vector<6x128x1xi32> to vector<6x128xi32>
    %86 = tpu.dynamic_gather %77[%85] in [1] : vector<6x128xf32>, vector<6x128xi32> -> vector<6x128xf32>
    %87 = vector.broadcast %78 : i32 to vector<6x128xi32>
    %88 = arith.cmpi eq, %11, %87 : vector<6x128xi32>
    %cst_21 = arith.constant 0.000000e+00 : f32
    %89 = vector.broadcast %cst_21 : f32 to vector<6x128xf32>
    %90 = arith.select %88, %86, %89 : vector<6x128xi1>, vector<6x128xf32>
    %91 = arith.addf %61, %90 : vector<6x128xf32>
    %c0_i32_22 = arith.constant 0 : i32
    %92 = vector.broadcast %c0_i32_22 : i32 to vector<6x128xi32>
    %93 = arith.cmpi slt, %10, %92 : vector<6x128xi32>
    %c128_i32_23 = arith.constant 128 : i32
    %94 = vector.broadcast %c128_i32_23 : i32 to vector<6x128xi32>
    %95 = arith.addi %10, %94 : vector<6x128xi32>
    %96 = arith.select %93, %95, %10 : vector<6x128xi1>, vector<6x128xi32>
    %97 = vector.shape_cast %96 : vector<6x128xi32> to vector<6x128x1xi32>
    %98 = vector.shape_cast %97 : vector<6x128x1xi32> to vector<6x128xi32>
    %99 = tpu.dynamic_gather %77[%98] in [1] : vector<6x128xf32>, vector<6x128xi32> -> vector<6x128xf32>
    %100 = vector.broadcast %78 : i32 to vector<6x128xi32>
    %101 = arith.cmpi eq, %12, %100 : vector<6x128xi32>
    %cst_24 = arith.constant 0.000000e+00 : f32
    %102 = vector.broadcast %cst_24 : f32 to vector<6x128xf32>
    %103 = arith.select %101, %99, %102 : vector<6x128xi1>, vector<6x128xf32>
    %104 = arith.addf %74, %103 : vector<6x128xf32>
    %c3 = arith.constant 3 : index
    %c0_25 = arith.constant 0 : index
    %105 = vector.load %arg3[%c3, %c0_25] : memref<8x128xf32, #tpu.memory_space<vmem>>, vector<1x128xf32>
    %106 = vector.shape_cast %105 : vector<1x128xf32> to vector<1x128xf32>
    %107 = vector.broadcast %106 : vector<1x128xf32> to vector<6x128xf32>
    %c3_i32 = arith.constant 3 : i32
    %108 = arith.addi %8, %c3_i32 : i32
    %c0_i32_26 = arith.constant 0 : i32
    %109 = vector.broadcast %c0_i32_26 : i32 to vector<6x128xi32>
    %110 = arith.cmpi slt, %9, %109 : vector<6x128xi32>
    %c128_i32_27 = arith.constant 128 : i32
    %111 = vector.broadcast %c128_i32_27 : i32 to vector<6x128xi32>
    %112 = arith.addi %9, %111 : vector<6x128xi32>
    %113 = arith.select %110, %112, %9 : vector<6x128xi1>, vector<6x128xi32>
    %114 = vector.shape_cast %113 : vector<6x128xi32> to vector<6x128x1xi32>
    %115 = vector.shape_cast %114 : vector<6x128x1xi32> to vector<6x128xi32>
    %116 = tpu.dynamic_gather %107[%115] in [1] : vector<6x128xf32>, vector<6x128xi32> -> vector<6x128xf32>
    %117 = vector.broadcast %108 : i32 to vector<6x128xi32>
    %118 = arith.cmpi eq, %11, %117 : vector<6x128xi32>
    %cst_28 = arith.constant 0.000000e+00 : f32
    %119 = vector.broadcast %cst_28 : f32 to vector<6x128xf32>
    %120 = arith.select %118, %116, %119 : vector<6x128xi1>, vector<6x128xf32>
    %121 = arith.addf %91, %120 : vector<6x128xf32>
    %c0_i32_29 = arith.constant 0 : i32
    %122 = vector.broadcast %c0_i32_29 : i32 to vector<6x128xi32>
    %123 = arith.cmpi slt, %10, %122 : vector<6x128xi32>
    %c128_i32_30 = arith.constant 128 : i32
    %124 = vector.broadcast %c128_i32_30 : i32 to vector<6x128xi32>
    %125 = arith.addi %10, %124 : vector<6x128xi32>
    %126 = arith.select %123, %125, %10 : vector<6x128xi1>, vector<6x128xi32>
    %127 = vector.shape_cast %126 : vector<6x128xi32> to vector<6x128x1xi32>
    %128 = vector.shape_cast %127 : vector<6x128x1xi32> to vector<6x128xi32>
    %129 = tpu.dynamic_gather %107[%128] in [1] : vector<6x128xf32>, vector<6x128xi32> -> vector<6x128xf32>
    %130 = vector.broadcast %108 : i32 to vector<6x128xi32>
    %131 = arith.cmpi eq, %12, %130 : vector<6x128xi32>
    %cst_31 = arith.constant 0.000000e+00 : f32
    %132 = vector.broadcast %cst_31 : f32 to vector<6x128xf32>
    %133 = arith.select %131, %129, %132 : vector<6x128xi1>, vector<6x128xf32>
    %134 = arith.addf %104, %133 : vector<6x128xf32>
    %c4 = arith.constant 4 : index
    %c0_32 = arith.constant 0 : index
    %135 = vector.load %arg3[%c4, %c0_32] : memref<8x128xf32, #tpu.memory_space<vmem>>, vector<1x128xf32>
    %136 = vector.shape_cast %135 : vector<1x128xf32> to vector<1x128xf32>
    %137 = vector.broadcast %136 : vector<1x128xf32> to vector<6x128xf32>
    %c4_i32 = arith.constant 4 : i32
    %138 = arith.addi %8, %c4_i32 : i32
    %c0_i32_33 = arith.constant 0 : i32
    %139 = vector.broadcast %c0_i32_33 : i32 to vector<6x128xi32>
    %140 = arith.cmpi slt, %9, %139 : vector<6x128xi32>
    %c128_i32_34 = arith.constant 128 : i32
    %141 = vector.broadcast %c128_i32_34 : i32 to vector<6x128xi32>
    %142 = arith.addi %9, %141 : vector<6x128xi32>
    %143 = arith.select %140, %142, %9 : vector<6x128xi1>, vector<6x128xi32>
    %144 = vector.shape_cast %143 : vector<6x128xi32> to vector<6x128x1xi32>
    %145 = vector.shape_cast %144 : vector<6x128x1xi32> to vector<6x128xi32>
    %146 = tpu.dynamic_gather %137[%145] in [1] : vector<6x128xf32>, vector<6x128xi32> -> vector<6x128xf32>
    %147 = vector.broadcast %138 : i32 to vector<6x128xi32>
    %148 = arith.cmpi eq, %11, %147 : vector<6x128xi32>
    %cst_35 = arith.constant 0.000000e+00 : f32
    %149 = vector.broadcast %cst_35 : f32 to vector<6x128xf32>
    %150 = arith.select %148, %146, %149 : vector<6x128xi1>, vector<6x128xf32>
    %151 = arith.addf %121, %150 : vector<6x128xf32>
    %c0_i32_36 = arith.constant 0 : i32
    %152 = vector.broadcast %c0_i32_36 : i32 to vector<6x128xi32>
    %153 = arith.cmpi slt, %10, %152 : vector<6x128xi32>
    %c128_i32_37 = arith.constant 128 : i32
    %154 = vector.broadcast %c128_i32_37 : i32 to vector<6x128xi32>
    %155 = arith.addi %10, %154 : vector<6x128xi32>
    %156 = arith.select %153, %155, %10 : vector<6x128xi1>, vector<6x128xi32>
    %157 = vector.shape_cast %156 : vector<6x128xi32> to vector<6x128x1xi32>
    %158 = vector.shape_cast %157 : vector<6x128x1xi32> to vector<6x128xi32>
    %159 = tpu.dynamic_gather %137[%158] in [1] : vector<6x128xf32>, vector<6x128xi32> -> vector<6x128xf32>
    %160 = vector.broadcast %138 : i32 to vector<6x128xi32>
    %161 = arith.cmpi eq, %12, %160 : vector<6x128xi32>
    %cst_38 = arith.constant 0.000000e+00 : f32
    %162 = vector.broadcast %cst_38 : f32 to vector<6x128xf32>
    %163 = arith.select %161, %159, %162 : vector<6x128xi1>, vector<6x128xf32>
    %164 = arith.addf %134, %163 : vector<6x128xf32>
    %c5 = arith.constant 5 : index
    %c0_39 = arith.constant 0 : index
    %165 = vector.load %arg3[%c5, %c0_39] : memref<8x128xf32, #tpu.memory_space<vmem>>, vector<1x128xf32>
    %166 = vector.shape_cast %165 : vector<1x128xf32> to vector<1x128xf32>
    %167 = vector.broadcast %166 : vector<1x128xf32> to vector<6x128xf32>
    %c5_i32 = arith.constant 5 : i32
    %168 = arith.addi %8, %c5_i32 : i32
    %c0_i32_40 = arith.constant 0 : i32
    %169 = vector.broadcast %c0_i32_40 : i32 to vector<6x128xi32>
    %170 = arith.cmpi slt, %9, %169 : vector<6x128xi32>
    %c128_i32_41 = arith.constant 128 : i32
    %171 = vector.broadcast %c128_i32_41 : i32 to vector<6x128xi32>
    %172 = arith.addi %9, %171 : vector<6x128xi32>
    %173 = arith.select %170, %172, %9 : vector<6x128xi1>, vector<6x128xi32>
    %174 = vector.shape_cast %173 : vector<6x128xi32> to vector<6x128x1xi32>
    %175 = vector.shape_cast %174 : vector<6x128x1xi32> to vector<6x128xi32>
    %176 = tpu.dynamic_gather %167[%175] in [1] : vector<6x128xf32>, vector<6x128xi32> -> vector<6x128xf32>
    %177 = vector.broadcast %168 : i32 to vector<6x128xi32>
    %178 = arith.cmpi eq, %11, %177 : vector<6x128xi32>
    %cst_42 = arith.constant 0.000000e+00 : f32
    %179 = vector.broadcast %cst_42 : f32 to vector<6x128xf32>
    %180 = arith.select %178, %176, %179 : vector<6x128xi1>, vector<6x128xf32>
    %181 = arith.addf %151, %180 : vector<6x128xf32>
    %c0_i32_43 = arith.constant 0 : i32
    %182 = vector.broadcast %c0_i32_43 : i32 to vector<6x128xi32>
    %183 = arith.cmpi slt, %10, %182 : vector<6x128xi32>
    %c128_i32_44 = arith.constant 128 : i32
    %184 = vector.broadcast %c128_i32_44 : i32 to vector<6x128xi32>
    %185 = arith.addi %10, %184 : vector<6x128xi32>
    %186 = arith.select %183, %185, %10 : vector<6x128xi1>, vector<6x128xi32>
    %187 = vector.shape_cast %186 : vector<6x128xi32> to vector<6x128x1xi32>
    %188 = vector.shape_cast %187 : vector<6x128x1xi32> to vector<6x128xi32>
    %189 = tpu.dynamic_gather %167[%188] in [1] : vector<6x128xf32>, vector<6x128xi32> -> vector<6x128xf32>
    %190 = vector.broadcast %168 : i32 to vector<6x128xi32>
    %191 = arith.cmpi eq, %12, %190 : vector<6x128xi32>
    %cst_45 = arith.constant 0.000000e+00 : f32
    %192 = vector.broadcast %cst_45 : f32 to vector<6x128xf32>
    %193 = arith.select %191, %189, %192 : vector<6x128xi1>, vector<6x128xf32>
    %194 = arith.addf %164, %193 : vector<6x128xf32>
    %c6 = arith.constant 6 : index
    %c0_46 = arith.constant 0 : index
    %195 = vector.load %arg3[%c6, %c0_46] : memref<8x128xf32, #tpu.memory_space<vmem>>, vector<1x128xf32>
    %196 = vector.shape_cast %195 : vector<1x128xf32> to vector<1x128xf32>
    %197 = vector.broadcast %196 : vector<1x128xf32> to vector<6x128xf32>
    %c6_i32 = arith.constant 6 : i32
    %198 = arith.addi %8, %c6_i32 : i32
    %c0_i32_47 = arith.constant 0 : i32
    %199 = vector.broadcast %c0_i32_47 : i32 to vector<6x128xi32>
    %200 = arith.cmpi slt, %9, %199 : vector<6x128xi32>
    %c128_i32_48 = arith.constant 128 : i32
    %201 = vector.broadcast %c128_i32_48 : i32 to vector<6x128xi32>
    %202 = arith.addi %9, %201 : vector<6x128xi32>
    %203 = arith.select %200, %202, %9 : vector<6x128xi1>, vector<6x128xi32>
    %204 = vector.shape_cast %203 : vector<6x128xi32> to vector<6x128x1xi32>
    %205 = vector.shape_cast %204 : vector<6x128x1xi32> to vector<6x128xi32>
    %206 = tpu.dynamic_gather %197[%205] in [1] : vector<6x128xf32>, vector<6x128xi32> -> vector<6x128xf32>
    %207 = vector.broadcast %198 : i32 to vector<6x128xi32>
    %208 = arith.cmpi eq, %11, %207 : vector<6x128xi32>
    %cst_49 = arith.constant 0.000000e+00 : f32
    %209 = vector.broadcast %cst_49 : f32 to vector<6x128xf32>
    %210 = arith.select %208, %206, %209 : vector<6x128xi1>, vector<6x128xf32>
    %211 = arith.addf %181, %210 : vector<6x128xf32>
    %c0_i32_50 = arith.constant 0 : i32
    %212 = vector.broadcast %c0_i32_50 : i32 to vector<6x128xi32>
    %213 = arith.cmpi slt, %10, %212 : vector<6x128xi32>
    %c128_i32_51 = arith.constant 128 : i32
    %214 = vector.broadcast %c128_i32_51 : i32 to vector<6x128xi32>
    %215 = arith.addi %10, %214 : vector<6x128xi32>
    %216 = arith.select %213, %215, %10 : vector<6x128xi1>, vector<6x128xi32>
    %217 = vector.shape_cast %216 : vector<6x128xi32> to vector<6x128x1xi32>
    %218 = vector.shape_cast %217 : vector<6x128x1xi32> to vector<6x128xi32>
    %219 = tpu.dynamic_gather %197[%218] in [1] : vector<6x128xf32>, vector<6x128xi32> -> vector<6x128xf32>
    %220 = vector.broadcast %198 : i32 to vector<6x128xi32>
    %221 = arith.cmpi eq, %12, %220 : vector<6x128xi32>
    %cst_52 = arith.constant 0.000000e+00 : f32
    %222 = vector.broadcast %cst_52 : f32 to vector<6x128xf32>
    %223 = arith.select %221, %219, %222 : vector<6x128xi1>, vector<6x128xf32>
    %224 = arith.addf %194, %223 : vector<6x128xf32>
    %c7 = arith.constant 7 : index
    %c0_53 = arith.constant 0 : index
    %225 = vector.load %arg3[%c7, %c0_53] : memref<8x128xf32, #tpu.memory_space<vmem>>, vector<1x128xf32>
    %226 = vector.shape_cast %225 : vector<1x128xf32> to vector<1x128xf32>
    %227 = vector.broadcast %226 : vector<1x128xf32> to vector<6x128xf32>
    %c7_i32_54 = arith.constant 7 : i32
    %228 = arith.addi %8, %c7_i32_54 : i32
    %c0_i32_55 = arith.constant 0 : i32
    %229 = vector.broadcast %c0_i32_55 : i32 to vector<6x128xi32>
    %230 = arith.cmpi slt, %9, %229 : vector<6x128xi32>
    %c128_i32_56 = arith.constant 128 : i32
    %231 = vector.broadcast %c128_i32_56 : i32 to vector<6x128xi32>
    %232 = arith.addi %9, %231 : vector<6x128xi32>
    %233 = arith.select %230, %232, %9 : vector<6x128xi1>, vector<6x128xi32>
    %234 = vector.shape_cast %233 : vector<6x128xi32> to vector<6x128x1xi32>
    %235 = vector.shape_cast %234 : vector<6x128x1xi32> to vector<6x128xi32>
    %236 = tpu.dynamic_gather %227[%235] in [1] : vector<6x128xf32>, vector<6x128xi32> -> vector<6x128xf32>
    %237 = vector.broadcast %228 : i32 to vector<6x128xi32>
    %238 = arith.cmpi eq, %11, %237 : vector<6x128xi32>
    %cst_57 = arith.constant 0.000000e+00 : f32
    %239 = vector.broadcast %cst_57 : f32 to vector<6x128xf32>
    %240 = arith.select %238, %236, %239 : vector<6x128xi1>, vector<6x128xf32>
    %241 = arith.addf %211, %240 : vector<6x128xf32>
    %c0_i32_58 = arith.constant 0 : i32
    %242 = vector.broadcast %c0_i32_58 : i32 to vector<6x128xi32>
    %243 = arith.cmpi slt, %10, %242 : vector<6x128xi32>
    %c128_i32_59 = arith.constant 128 : i32
    %244 = vector.broadcast %c128_i32_59 : i32 to vector<6x128xi32>
    %245 = arith.addi %10, %244 : vector<6x128xi32>
    %246 = arith.select %243, %245, %10 : vector<6x128xi1>, vector<6x128xi32>
    %247 = vector.shape_cast %246 : vector<6x128xi32> to vector<6x128x1xi32>
    %248 = vector.shape_cast %247 : vector<6x128x1xi32> to vector<6x128xi32>
    %249 = tpu.dynamic_gather %227[%248] in [1] : vector<6x128xf32>, vector<6x128xi32> -> vector<6x128xf32>
    %250 = vector.broadcast %228 : i32 to vector<6x128xi32>
    %251 = arith.cmpi eq, %12, %250 : vector<6x128xi32>
    %cst_60 = arith.constant 0.000000e+00 : f32
    %252 = vector.broadcast %cst_60 : f32 to vector<6x128xf32>
    %253 = arith.select %251, %249, %252 : vector<6x128xi1>, vector<6x128xf32>
    %254 = arith.addf %224, %253 : vector<6x128xf32>
    %c0_61 = arith.constant 0 : index
    %c0_62 = arith.constant 0 : index
    %255 = vector.load %arg4[%c0_61, %c0_62] : memref<1x256xf32, #tpu.memory_space<vmem>>, vector<1x128xf32>
    %cst_63 = arith.constant dense<0.000000e+00> : vector<128xf32>
    %256 = vector.multi_reduction <add>, %241, %cst_63 [0] : vector<6x128xf32> to vector<128xf32>
    %257 = vector.shape_cast %256 : vector<128xf32> to vector<1x128xf32>
    %258 = arith.addf %255, %257 : vector<1x128xf32>
    %c0_64 = arith.constant 0 : index
    %c0_65 = arith.constant 0 : index
    %259 = vector.load %arg4[%c0_64, %c0_65] : memref<1x256xf32, #tpu.memory_space<vmem>>, vector<1x128xf32>
    tpu.vector_store %arg4[%c0_64, %c0_65], %258 {strides = array<i32>} : memref<1x256xf32, #tpu.memory_space<vmem>>, vector<1x128xf32>,
    %c0_66 = arith.constant 0 : index
    %c128 = arith.constant 128 : index
    %260 = vector.load %arg4[%c0_66, %c128] : memref<1x256xf32, #tpu.memory_space<vmem>>, vector<1x128xf32>
    %cst_67 = arith.constant dense<0.000000e+00> : vector<128xf32>
    %261 = vector.multi_reduction <add>, %254, %cst_67 [0] : vector<6x128xf32> to vector<128xf32>
    %262 = vector.shape_cast %261 : vector<128xf32> to vector<1x128xf32>
    %263 = arith.addf %260, %262 : vector<1x128xf32>
    %c0_68 = arith.constant 0 : index
    %c128_69 = arith.constant 128 : index
    %264 = vector.load %arg4[%c0_68, %c128_69] : memref<1x256xf32, #tpu.memory_space<vmem>>, vector<1x128xf32>
    tpu.vector_store %arg4[%c0_68, %c128_69], %263 {strides = array<i32>} : memref<1x256xf32, #tpu.memory_space<vmem>>, vector<1x128xf32>,
    return
  }
  func.func @transform_0(%arg0: i32, %arg1: i32) -> (i32, i32) {
    %c0_i32 = arith.constant 0 : i32
    %c0_i32_0 = arith.constant 0 : i32
    return %c0_i32, %arg0 : i32, i32
  }
  func.func @transform_1(%arg0: i32, %arg1: i32) -> (i32, i32) {
    %c0_i32 = arith.constant 0 : i32
    %c0_i32_0 = arith.constant 0 : i32
    return %arg1, %c0_i32 : i32, i32
  }
  func.func @transform_2(%arg0: i32, %arg1: i32) -> (i32, i32) {
    %c0_i32 = arith.constant 0 : i32
    %c0_i32_0 = arith.constant 0 : i32
    return %c0_i32, %arg0 : i32, i32
  }
}

</mosaic_0001>

<bundles_post_ra>
// kernel: tpu_custom_call.1
= control target key start
LH: loop header
LB: loop body
LE: loop exit
PB: predicated region body
PF: predicated region fallthrough
CT: control target
= control target key end

     0   :  { %7 = vsyncpa [#allocation3], 0  ;;  %s396_s0 = inlined_call_operand.hbm [shape: s32[6,200], index: 0, kind: input, shape index: {}]   ;;  %s397_s1 = inlined_call_operand.hbm [shape: f32[8,128], index: 1, kind: input, shape index: {}]   ;;  %s398_s2 = inlined_call_operand.hbm [shape: f32[1,256], index: 2, kind: output, shape index: {}]  }
   0x1   :  { %8 = vsyncpa [#allocation6], 0 }
   0x2   :  { %9 = vsyncpa [#allocation4], 0  ;;  %s339_s9 = smov [#allocation2]   ;;  %s340_s11 = smov [#allocation5]  }
   0x3   :  { %s16_s10 = sshll.u32 %s339_s9, 4  ;;  %s26_s12 = sshll.u32 %s340_s11, 4  ;;  %s17_s10 = int_to_ptr.vmem [resolvable:$true] %s16_s10  ;;  %s27_s12 = int_to_ptr.vmem [resolvable:$true] %s26_s12 }
   0x4   :  { %s267_s15 = scalar_lea.hbm %s396_s0, 256 }
   0x5   :  { %p268_p0 = scmp.ne.s32.totalorder %s396_s0, %s267_s15  ;;  %p271_p1 = scmp.lt.u32.totalorder %s267_s15, %s396_s0 }
   0x7   :  { %p273_p2 = pnand %p271_p1, %p268_p0 }
   0x9   :  { %276 = shalt.err (!%p273_p2)
}
   0xa   :  { %s277_s20 = scalar_lea.vmem %s17_s10, 256  ;;  %p282_p4 = scmp.lt.s32.totalorder %s17_s10, %s17_s10 }
   0xb   :  { %p278_p3 = scmp.ne.s32.totalorder %s17_s10, %s277_s20  ;;  %p283_p5 = scmp.lt.s32.totalorder %s277_s20, %s277_s20 }
   0xd   :  { %p284_p6 = por %p283_p5, %p282_p4 }
   0xf   :  { %p285_p7 = pnand %p284_p6, %p278_p3 }
  0x11   :  { %288 = shalt.err (!%p285_p7)
}
  0x12   :  { %19 = dma.hbm_to_vmem [thread:$0]  %s396_s0, 256, %s17_s10, [#allocation3]  }
  0x13   :  { %s289_s25 = scalar_lea.hbm %s397_s1, 128 }
  0x14   :  { %p290_p8 = scmp.ne.s32.totalorder %s397_s1, %s289_s25  ;;  %p293_p9 = scmp.lt.u32.totalorder %s289_s25, %s397_s1 }
  0x16   :  { %p295_p10 = pnand %p293_p9, %p290_p8 }
  0x18   :  { %298 = shalt.err (!%p295_p10)
}
  0x19   :  { %s299_s30 = scalar_lea.vmem %s27_s12, 128  ;;  %p304_p12 = scmp.lt.s32.totalorder %s27_s12, %s27_s12 }
  0x1a   :  { %p300_p11 = scmp.ne.s32.totalorder %s27_s12, %s299_s30  ;;  %p305_p13 = scmp.lt.s32.totalorder %s299_s30, %s299_s30 }
  0x1c   :  { %p306_p0 = por %p305_p13, %p304_p12 }
  0x1e   :  { %p307_p1 = pnand %p306_p0, %p300_p11 }
  0x20   :  { %310 = shalt.err (!%p307_p1)
}
  0x21   :  { %29 = dma.hbm_to_vmem [thread:$0]  %s397_s1, 128, %s27_s12, [#allocation6]  }
  0x22   :  { %333 = dma.done.wait [#allocation3], 256  }
  0x23   :  { %334 = vsyncadd [#allocation3], 4294967040 }
  0x24   :  { %335 = dma.done.wait [#allocation6], 128  }
  0x25   :  { %336 = vsyncadd [#allocation6], 4294967168  ;;  %v45_v0 = vld [vmem:[#allocation2] sm:$0x3f]  ;;  %v46_v2 = vld [vmem:[#allocation2 + $0x8] sm:$0x3f]  ;;  %v40_v16 = vlaneseq }
  0x26   :  { %v49_v1 = vand.u32 127, %v45_v0  ;;  %v50_v4 = vand.u32 127, %v46_v2  ;;  %v251_v6 = vld [vmem:[#allocation5 + $0x1] ss:$0 sm:$0xff]  ;;  %v250_v7 = vld [vmem:[#allocation5] ss:$0 sm:$0xff] }
  0x27   :  { %v252_v10 = vld [vmem:[#allocation5 + $0x2] ss:$0 sm:$0xff]  ;;  %v253_v11 = vld [vmem:[#allocation5 + $0x3] ss:$0 sm:$0xff]  ;;  %v254_v12 = vld [vmem:[#allocation5 + $0x4] ss:$0 sm:$0xff] }
  0x28   :  { %vm57_vm0 = vcmp.lt.s32.totalorder %v49_v1, 0  ;;  %v58_v3 = vadd.s32 128, %v49_v1  ;;  %v68_v8 = vadd.s32 128, %v50_v4  ;;  %vm67_vm1 = vcmp.lt.s32.totalorder %v50_v4, 0  ;;  %v255_v13 = vld [vmem:[#allocation5 + $0x5] ss:$0 sm:$0xff] }
  0x29   :  { %v256_v14 = vld [vmem:[#allocation5 + $0x6] ss:$0 sm:$0xff]  ;;  %v257_v15 = vld [vmem:[#allocation5 + $0x7] ss:$0 sm:$0xff]  ;;  %vm42_vm2 = vcmp.lt.s32.totalorder %v40_v16, 256  ;;  %v341_v17 = vmov 0.0  }
  0x2a   :  { %v59_v5 = vsel %vm57_vm0, %v58_v3, %v49_v1  ;;  %v69_v9 = vsel %vm67_vm1, %v68_v8, %v50_v4  ;;  %44 = vst.msk [vmem:[#allocation7] sm:$0x3] %vm42_vm2, %v341_v17  ;;  %v48_v21 = vshra.s32 %v46_v2, 7  ;;  %v47_v24 = vshra.s32 %v45_v0, 7  ;;  %s342_s1 = smov [#allocation7]  }
  0x2b   :  { %264 = vset.pattern.permute.xlu1 %v59_v5  ;;  %262 = vset.pattern.permute.xlu0 %v59_v5  ;;  %vm210_vm2 = vcmask 1045504   ;;  %s240_s4 = sshll.u32 %s342_s1, 4  ;;  %s241_s4 = int_to_ptr.vmem [resolvable:$true] %s240_s4 }
  0x2c   :  { %vm92_vm3 = vcmp.eq.s32.totalorder %v48_v21, 1  ;;  %vm73_vm4 = vcmp.eq.s32.totalorder %v48_v21, 0  ;;  %vm111_vm5 = vcmp.eq.s32.totalorder %v48_v21, 2  ;;  %vm86_vm6 = vcmp.eq.s32.totalorder %v47_v24, 1  ;;  %s311_s5 = scalar_lea.vmem %s241_s4, 32  ;;  %p316_p3 = scmp.lt.s32.totalorder %s241_s4, %s241_s4 }
  0x2d   :  { %vm64_vm7 = vcmp.eq.s32.totalorder %v47_v24, 0  ;;  %vm130_vm8 = vcmp.eq.s32.totalorder %v48_v21, 3  ;;  %vm105_vm9 = vcmp.eq.s32.totalorder %v47_v24, 2  ;;  %vm149_vm10 = vcmp.eq.s32.totalorder %v48_v21, 4  ;;  %p312_p2 = scmp.ne.s32.totalorder %s241_s4, %s311_s5  ;;  %p317_p4 = scmp.lt.s32.totalorder %s311_s5, %s311_s5 }
  0x2e   :  { %vm124_vm11 = vcmp.eq.s32.totalorder %v47_v24, 3  ;;  %vm168_vm12 = vcmp.eq.s32.totalorder %v48_v21, 5  ;;  %vm143_vm13 = vcmp.eq.s32.totalorder %v47_v24, 4  ;;  %vm187_vm14 = vcmp.eq.s32.totalorder %v48_v21, 6 }
  0x2f   :  { %83 = vperm.xlu1 %264, %v251_v6   ;;  %61 = vperm.xlu0 %262, %v250_v7   ;;  %vm162_vm15 = vcmp.eq.s32.totalorder %v47_v24, 5  ;;  %vm181_vm0 = vcmp.eq.s32.totalorder %v47_v24, 6  ;;  %vm206_vm1 = vcmp.eq.s32.totalorder %v48_v21, 7  ;;  %p318_p5 = por %p317_p4, %p316_p3 }
  0x31   :  { %p319_p6 = pnand %p318_p5, %p312_p2 }
  0x33   :  { %265 = vset.pattern.permute.xlu1 %v69_v9  ;;  %263 = vset.pattern.permute.xlu0 %v69_v9 }
  0x37   :  { %90 = vperm.xlu1 %265, %v251_v6   ;;  %71 = vperm.xlu0 %263, %v250_v7  }
  0x3b   :  { %266 = vset.pattern.permute.xlu1 %v59_v5  ;;  %109 = vperm.xlu0 %263, %v252_v10  }
  0x3f   :  { %102 = vperm.xlu1 %266, %v252_v10   ;;  %128 = vperm.xlu0 %263, %v253_v11  }
  0x43   :  { %121 = vperm.xlu1 %266, %v253_v11   ;;  %147 = vperm.xlu0 %263, %v254_v12  }
  0x47   :  { %140 = vperm.xlu1 %266, %v254_v12   ;;  %166 = vperm.xlu0 %263, %v255_v13   ;;  %v224_v12 = vld [vmem:[#allocation7 + $0x1] sm:$0x1] }
  0x4b   :  { %159 = vperm.xlu1 %266, %v255_v13   ;;  %185 = vperm.xlu0 %263, %v256_v14  }
  0x4f   :  { %178 = vperm.xlu1 %266, %v256_v14   ;;  %204 = vperm.xlu0 %263, %v257_v15  }
  0x53   :  { %197 = vperm.xlu1 %266, %v257_v15  }
  0xae   :  { %v62_v18 = vpop.permute.xlu0 %61  ;;  %v84_v19 = vpop.permute.xlu1 %83 }
  0xaf   :  { %v87_v33 = vsel %vm86_vm6, %v84_v19, 0.0  ;;  %v65_v34 = vsel %vm64_vm7, %v62_v18, 0.0  ;;  %v209_v18 = vld [vmem:[#allocation7] sm:$0x1] }
  0xb0   :  { %v88_v41 = vadd.f32 %v87_v33, %v65_v34 }
  0xb6   :  { %v72_v20 = vpop.permute.xlu0 %71  ;;  %v91_v22 = vpop.permute.xlu1 %90 }
  0xb7   :  { %v93_v27 = vsel %vm92_vm3, %v91_v22, 0.0  ;;  %v74_v28 = vsel %vm73_vm4, %v72_v20, 0.0  ;;  %vm200_vm3 = vcmp.eq.s32.totalorder %v47_v24, 7  ;;  %vm221_vm4 = vcmp.lt.s32.totalorder %v40_v16, 128 }
  0xb8   :  { %v94_v32 = vadd.f32 %v93_v27, %v74_v28 }
  0xba   :  { %v110_v23 = vpop.permute.xlu0 %109 }
  0xbb   :  { %v112_v31 = vsel %vm111_vm5, %v110_v23, 0.0 }
  0xbc   :  { %v113_v36 = vadd.f32 %v112_v31, %v94_v32 }
  0xbe   :  { %v103_v25 = vpop.permute.xlu1 %102  ;;  %v129_v26 = vpop.permute.xlu0 %128 }
  0xbf   :  { %v131_v35 = vsel %vm130_vm8, %v129_v26, 0.0  ;;  %v106_v39 = vsel %vm105_vm9, %v103_v25, 0.0 }
  0xc0   :  { %v132_v42 = vadd.f32 %v131_v35, %v113_v36  ;;  %v107_v45 = vadd.f32 %v106_v39, %v88_v41 }
  0xc2   :  { %v122_v29 = vpop.permute.xlu1 %121  ;;  %v148_v30 = vpop.permute.xlu0 %147 }
  0xc3   :  { %v150_v40 = vsel %vm149_vm10, %v148_v30, 0.0  ;;  %v125_v43 = vsel %vm124_vm11, %v122_v29, 0.0 }
  0xc4   :  { %v151_v46 = vadd.f32 %v150_v40, %v132_v42  ;;  %v126_v51 = vadd.f32 %v125_v43, %v107_v45 }
  0xc6   :  { %v141_v37 = vpop.permute.xlu1 %140  ;;  %v167_v38 = vpop.permute.xlu0 %166 }
  0xc7   :  { %v169_v44 = vsel %vm168_vm12, %v167_v38, 0.0  ;;  %v144_v49 = vsel %vm143_vm13, %v141_v37, 0.0 }
  0xc8   :  { %v170_v52 = vadd.f32 %v169_v44, %v151_v46  ;;  %v145_v54 = vadd.f32 %v144_v49, %v126_v51 }
  0xca   :  { %v160_v47 = vpop.permute.xlu1 %159  ;;  %v186_v48 = vpop.permute.xlu0 %185 }
  0xcb   :  { %v188_v50 = vsel %vm187_vm14, %v186_v48, 0.0  ;;  %v163_v53 = vsel %vm162_vm15, %v160_v47, 0.0 }
  0xcc   :  { %v189_v55 = vadd.f32 %v188_v50, %v170_v52  ;;  %v164_v60 = vadd.f32 %v163_v53, %v145_v54 }
  0xce   :  { %v179_v56 = vpop.permute.xlu1 %178  ;;  %v205_v57 = vpop.permute.xlu0 %204 }
  0xcf   :  { %v182_v58 = vsel %vm181_vm0, %v179_v56, 0.0  ;;  %v207_v59 = vsel %vm206_vm1, %v205_v57, 0.0 }
  0xd0   :  { %v208_v61 = vadd.f32 %v207_v59, %v189_v55  ;;  %v183_v62 = vadd.f32 %v182_v58, %v164_v60 }
  0xd2   :  { %v225_v63 = vsel %vm210_vm2, %v208_v61, 0.0  ;;  %v198_v0 = vpop.permute.xlu1 %197 }
  0xd3   :  { %v226_v1 = vrot.slane %v225_v63, 4  ;;  %v201_v2 = vsel %vm200_vm3, %v198_v0, 0.0 }
  0xd4   :  { %v202_v3 = vadd.f32 %v201_v2, %v183_v62 }
  0xd5   :  { %v227_v4 = vadd.f32 %v226_v1, %v225_v63 }
  0xd6   :  { %v211_v5 = vsel %vm210_vm2, %v202_v3, 0.0 }
  0xd7   :  { %v228_v6 = vrot.slane %v227_v4, 2  ;;  %v212_v7 = vrot.slane %v211_v5, 4 }
  0xd9   :  { %v229_v8 = vadd.f32 %v228_v6, %v227_v4  ;;  %v213_v9 = vadd.f32 %v212_v7, %v211_v5 }
  0xdb   :  { %v230_v10 = vrot.slane %v229_v8, 1  ;;  %v214_v11 = vrot.slane %v213_v9, 2 }
  0xdd   :  { %v231_v13 = vadd.f32 %v230_v10, %v229_v8  ;;  %v215_v14 = vadd.f32 %v214_v11, %v213_v9 }
  0xdf   :  { %v216_v15 = vrot.slane %v215_v14, 1  ;;  %v232_v17 = vadd.f32 %v231_v13, %v224_v12 }
  0xe1   :  { %v217_v19 = vadd.f32 %v216_v15, %v215_v14  ;;  %233 = vst.msk [vmem:[#allocation7 + $0x1] sm:$0x1] %vm221_vm4, %v232_v17 }
  0xe3   :  { %v218_v20 = vadd.f32 %v217_v19, %v209_v18 }
  0xe5   :  { %223 = vst.msk [vmem:[#allocation7] sm:$0x1] %vm221_vm4, %v218_v20 }
  0xe6   :  { %322 = shalt.err (!%p319_p6)
}
  0xe7   :  { %s323_s8 = scalar_lea.hbm %s398_s2, 32 }
  0xe8   :  { %p324_p7 = scmp.ne.s32.totalorder %s398_s2, %s323_s8  ;;  %p327_p8 = scmp.lt.u32.totalorder %s323_s8, %s398_s2 }
  0xea   :  { %p329_p9 = pnand %p327_p8, %p324_p7 }
  0xec   :  { %332 = shalt.err (!%p329_p9)
}
  0xed   :  { %243 = dma.vmem_to_hbm [thread:$0]  %s241_s4, 32, %s398_s2, [#allocation4]  }
  0xee   :  { %337 = dma.done.wait [#allocation4], 32  }
  0xef   :  { %338 = vsyncadd [#allocation4], 4294967264 }
  0xf0   :  { %247 = vsyncpa [#allocation3], 1 }
  0xf1   :  { %248 = vsyncpa [#allocation6], 1 }
  0xf2   :  { %249 = vsyncpa [#allocation4], 1 }

</bundles_post_ra>
